<compile_context>
chip_gen: v7x
topology: tpu7x:2x2x1
jax: 0.10.0
libtpu: 0.0.40
codegen_flags: <defaults>
</compile_context>

<pallas_src>
import functools

import jax
import jax.numpy as jnp
from jax.experimental import pallas as pl
from jax.experimental.pallas import tpu as pltpu


def _prompt_concat_kernel(ctx_ref, prefix_ref, suffix_ref, out_ref):
    # ctx_ref:    (n_ctx, D)               shared context (constant block index)
    # prefix_ref: (class_tile, 1, D)       SOS rows for this class tile
    # suffix_ref: (class_tile, L_suf, D)   class-name/EOS/pad rows for this tile
    # out_ref:    (class_tile, 1 + n_ctx + L_suf, D)
    n_ctx, d = ctx_ref.shape
    class_tile = out_ref.shape[0]

    # Row 0: per-class SOS embedding.
    out_ref[:, 0:1, :] = prefix_ref[...]

    # Rows [1, 1+n_ctx): shared learned context, broadcast across the tile.
    ctx_b = jnp.broadcast_to(ctx_ref[...][None, :, :], (class_tile, n_ctx, d))
    out_ref[:, 1:1 + n_ctx, :] = ctx_b.astype(out_ref.dtype)

    # Rows [1+n_ctx, L): per-class name / EOS / padding embeddings.
    out_ref[:, 1 + n_ctx:, :] = suffix_ref[...]


def prompt_learner_forward(ctx, token_prefix, token_suffix, *, class_tile=None):
    """prompts = concat([prefix, broadcast(ctx), suffix], dim=1)."""
    n_ctx, ctx_dim = ctx.shape
    n_cls, one, d_p = token_prefix.shape
    n_cls2, l_suf, d_s = token_suffix.shape
    assert one == 1 and d_p == ctx_dim and d_s == ctx_dim and n_cls2 == n_cls
    seq_len = 1 + n_ctx + l_suf
    dtype = token_prefix.dtype

    if class_tile is None:
        # Prefer >= 2 grid steps so a "parallel" axis can use both v7x cores.
        class_tile = n_cls // 2 if (n_cls % 2 == 0 and n_cls >= 2) else n_cls
    assert n_cls % class_tile == 0, "class_tile must divide n_cls"
    grid = (n_cls // class_tile,)

    grid_spec = pltpu.PrefetchScalarGridSpec(
        num_scalar_prefetch=0,
        grid=grid,
        in_specs=[
            # Shared ctx block: constant block index -> loaded into VMEM once.
            pl.BlockSpec((n_ctx, ctx_dim), lambda i: (0, 0)),
            pl.BlockSpec((class_tile, 1, ctx_dim), lambda i: (i, 0, 0)),
            pl.BlockSpec((class_tile, l_suf, ctx_dim), lambda i: (i, 0, 0)),
        ],
        out_specs=pl.BlockSpec((class_tile, seq_len, ctx_dim), lambda i: (i, 0, 0)),
    )

    return pl.pallas_call(
        _prompt_concat_kernel,
        out_shape=jax.ShapeDtypeStruct((n_cls, seq_len, ctx_dim), dtype),
        grid_spec=grid_spec,
        compiler_params=pltpu.CompilerParams(
            dimension_semantics=("parallel",),
            vmem_limit_bytes=32 * 1024 * 1024,  # explicit, safe on v5e/v6e/v7x
        ),
    )(ctx.astype(dtype), token_prefix, token_suffix)


def reference_forward(ctx, token_prefix, token_suffix):
    n_cls = token_prefix.shape[0]
    ctx_b = jnp.broadcast_to(
        ctx[None, :, :].astype(token_prefix.dtype), (n_cls,) + ctx.shape
    )
    return jnp.concatenate([token_prefix, ctx_b, token_suffix], axis=1)


if __name__ == "__main__":
    # Small shapes consistent with the module: n_ctx = 16 (as in __init__),
    # CLIP context_length = 77, ctx_dim lane-dense (multiple of 128; real CLIP
    # text widths 512/768 also satisfy this).
    n_cls = 8
    n_ctx = 16
    ctx_dim = 128
    context_length = 77
    l_suf = context_length - 1 - n_ctx  # 60
    dtype = jnp.float32                 # bf16 also works

    key = jax.random.PRNGKey(0)
    k_ctx, k_pre, k_suf = jax.random.split(key, 3)

    # nn.init.normal_(ctx_vectors, std=0.02)
    ctx = (0.02 * jax.random.normal(k_ctx, (n_ctx, ctx_dim))).astype(dtype)
    # TODO(synk): tokenizer + token_embedding have no Pallas equivalent; the
    # constant prefix/suffix buffers are synthesized deterministically here.
    token_prefix = jax.random.normal(k_pre, (n_cls, 1, ctx_dim)).astype(dtype)
    token_suffix = jax.random.normal(k_suf, (n_cls, l_suf, ctx_dim)).astype(dtype)

    ref = reference_forward(ctx, token_prefix, token_suffix)

    forward = jax.jit(functools.partial(prompt_learner_forward, class_tile=4))
    out = jax.block_until_ready(forward(ctx, token_prefix, token_suffix))

    assert out.shape == (n_cls, context_length, ctx_dim), out.shape
    assert out.dtype == dtype
    assert jnp.allclose(out, ref), "mismatch vs reference concat"
    print("KERNEL_OK")
</pallas_src>

<mosaic_0001>
module attributes {stable_mosaic.version = 11 : i64} {
  func.func @_prompt_concat_kernel(%arg0: i32, %arg1: memref<16x128xf32, #tpu.memory_space<vmem>>, %arg2: memref<4x1x128xf32, #tpu.memory_space<vmem>>, %arg3: memref<4x60x128xf32, #tpu.memory_space<vmem>>, %arg4: memref<4x77x128xf32, #tpu.memory_space<vmem>>) attributes {dimension_semantics = [#tpu.dimension_semantics<parallel>], iteration_bounds = array<i64: 2>, scalar_prefetch = 0 : i64, scratch_operands = 0 : i64, tpu.core_type = #tpu.core_type<tc>, window_params = [{pipeline_mode = #tpu.pipeline_mode<synchronous>, transform_indices = @transform_0, window_bounds = array<i64: 16, 128>}, {transform_indices = @transform_1, window_bounds = array<i64: 4, 1, 128>}, {transform_indices = @transform_2, window_bounds = array<i64: 4, 60, 128>}, {transform_indices = @transform_3, window_bounds = array<i64: 4, 77, 128>}]} {
    %c0 = arith.constant 0 : index
    %c0_0 = arith.constant 0 : index
    %c0_1 = arith.constant 0 : index
    %0 = vector.load %arg2[%c0, %c0_0, %c0_1] : memref<4x1x128xf32, #tpu.memory_space<vmem>>, vector<4x1x128xf32>
    %c0_2 = arith.constant 0 : index
    %c0_3 = arith.constant 0 : index
    %c0_4 = arith.constant 0 : index
    %1 = vector.load %arg4[%c0_2, %c0_3, %c0_4] : memref<4x77x128xf32, #tpu.memory_space<vmem>>, vector<4x1x128xf32>
    tpu.vector_store %arg4[%c0_2, %c0_3, %c0_4], %0 {strides = array<i32>} : memref<4x77x128xf32, #tpu.memory_space<vmem>>, vector<4x1x128xf32>,
    %c0_5 = arith.constant 0 : index
    %c0_6 = arith.constant 0 : index
    %2 = vector.load %arg1[%c0_5, %c0_6] : memref<16x128xf32, #tpu.memory_space<vmem>>, vector<16x128xf32>
    %3 = vector.shape_cast %2 : vector<16x128xf32> to vector<1x16x128xf32>
    %4 = vector.shape_cast %3 : vector<1x16x128xf32> to vector<1x16x128xf32>
    %5 = vector.broadcast %4 : vector<1x16x128xf32> to vector<4x16x128xf32>
    %c0_7 = arith.constant 0 : index
    %c1 = arith.constant 1 : index
    %c0_8 = arith.constant 0 : index
    %6 = vector.load %arg4[%c0_7, %c1, %c0_8] : memref<4x77x128xf32, #tpu.memory_space<vmem>>, vector<4x16x128xf32>
    tpu.vector_store %arg4[%c0_7, %c1, %c0_8], %5 {strides = array<i32>} : memref<4x77x128xf32, #tpu.memory_space<vmem>>, vector<4x16x128xf32>,
    %c0_9 = arith.constant 0 : index
    %c0_10 = arith.constant 0 : index
    %c0_11 = arith.constant 0 : index
    %7 = vector.load %arg3[%c0_9, %c0_10, %c0_11] : memref<4x60x128xf32, #tpu.memory_space<vmem>>, vector<4x60x128xf32>
    %c0_12 = arith.constant 0 : index
    %c17 = arith.constant 17 : index
    %c0_13 = arith.constant 0 : index
    %8 = vector.load %arg4[%c0_12, %c17, %c0_13] : memref<4x77x128xf32, #tpu.memory_space<vmem>>, vector<4x60x128xf32>
    tpu.vector_store %arg4[%c0_12, %c17, %c0_13], %7 {strides = array<i32>} : memref<4x77x128xf32, #tpu.memory_space<vmem>>, vector<4x60x128xf32>,
    return
  }
  func.func @transform_0(%arg0: i32) -> (i32, i32) {
    %c0_i32 = arith.constant 0 : i32
    %c0_i32_0 = arith.constant 0 : i32
    %c0_i32_1 = arith.constant 0 : i32
    return %c0_i32, %c0_i32_0 : i32, i32
  }
  func.func @transform_1(%arg0: i32) -> (i32, i32, i32) {
    %c0_i32 = arith.constant 0 : i32
    %c0_i32_0 = arith.constant 0 : i32
    %c0_i32_1 = arith.constant 0 : i32
    return %arg0, %c0_i32, %c0_i32_0 : i32, i32, i32
  }
  func.func @transform_2(%arg0: i32) -> (i32, i32, i32) {
    %c0_i32 = arith.constant 0 : i32
    %c0_i32_0 = arith.constant 0 : i32
    %c0_i32_1 = arith.constant 0 : i32
    return %arg0, %c0_i32, %c0_i32_0 : i32, i32, i32
  }
  func.func @transform_3(%arg0: i32) -> (i32, i32, i32) {
    %c0_i32 = arith.constant 0 : i32
    %c0_i32_0 = arith.constant 0 : i32
    %c0_i32_1 = arith.constant 0 : i32
    return %arg0, %c0_i32, %c0_i32_0 : i32, i32, i32
  }
}

</mosaic_0001>

<bundles_post_ra>
// kernel: prompt_learner_forward.1
= control target key start
LH: loop header
LB: loop body
LE: loop exit
PB: predicated region body
PF: predicated region fallthrough
CT: control target
= control target key end

     0   :  { %s398_s12 = smov 0   ;;  %s510_s0 = inlined_call_operand.vmem [shape: f32[16,128], index: 0, kind: input, shape index: {}]   ;;  %s511_s1 = inlined_call_operand.vmem [shape: f32[8,1,128], index: 1, kind: input, shape index: {}]   ;;  %s512_s2 = inlined_call_operand.vmem [shape: f32[8,60,128], index: 2, kind: input, shape index: {}]   ;;  %s513_s3 = inlined_call_operand.vmem [shape: f32[8,77,128], index: 3, kind: output, shape index: {}]  }
   0x1 LB: > { %s347_s13 = sadd.s32 4294967295, %s376_s12   ;;  %p351_p0 = scmp.ge.s32.totalorder %s376_s12, 1  ;;  %s376_s12 = sphi %s398_s12, %s13_s12  }
   0x2   : > { %p149_p1 = scmp.lt.s32.totalorder %s376_s12, 3 }
   0x4   : > { %p150_p2 = pnand %p351_p0, %p149_p1 }
   0x5   : > { %s352_s14 = sshll.u32 (!%p150_p2), %s347_s13, 2  ;;  %v206_v0 = vld [vmem:[%s510_s0] sm:$0xff] (!%p150_p2)  ;;  %v207_v2 = vld [vmem:[%s510_s0 + $0x8] sm:$0xff] (!%p150_p2) }
   0x6   : > { %153 = sbr.rel (%p150_p2) target bundleno = 40 (0x28), region = 32  ;;  %p180_p3 = scmp.lt.s32.totalorder (!%p150_p2), %s352_s14, 7 }
   0xd   : > { %s515_s14 = smov (!%p180_p3, %s352_s14), 7 }
   0xe   : > { %s409_s17 = scalar_lea.vmem %s511_s1, %s515_s14  ;;  %s360_s18 = sshll.u32 %s515_s14, 6 }
   0xf   : > { %s417_s23 = scalar_lea.vmem %s512_s2, %s360_s18  ;;  %s361_s24 = smul.u32 80, %s515_s14  ;;  %v198_v1 = vld [vmem:[%s409_s17] sm:$0x1]  ;;  %v199_v3 = vld [vmem:[%s409_s17 + $0x1] sm:$0x1] }
  0x10   : > { %v216_v4 = vld [vmem:[%s417_s23] sm:$0xff]  ;;  %v217_v5 = vld [vmem:[%s417_s23 + $0x8] sm:$0xff]  ;;  %v218_v6 = vld [vmem:[%s417_s23 + $0x10] sm:$0xff] }
  0x11   : > { %s430_s29 = scalar_lea.vmem %s513_s3, %s361_s24  ;;  %v219_v7 = vld [vmem:[%s417_s23 + $0x18] sm:$0xff]  ;;  %v220_v8 = vld [vmem:[%s417_s23 + $0x20] sm:$0xff]  ;;  %v221_v9 = vld [vmem:[%s417_s23 + $0x28] sm:$0xff] }
  0x12   : > { %202 = vst [vmem:[%s430_s29] sm:$0x1] %v198_v1  ;;  %208 = vst [vmem:[%s430_s29 + $0x1] sm:$0xff] %v206_v0  ;;  %v222_v10 = vld [vmem:[%s417_s23 + $0x30] sm:$0xff]  ;;  %v223_v11 = vld [vmem:[%s417_s23 + $0x38] sm:$0xf] }
  0x13   : > { %209 = vst [vmem:[%s430_s29 + $0x9] sm:$0xff] %v207_v2  ;;  %248 = vst [vmem:[%s430_s29 + $0x11] sm:$0xff] %v216_v4  ;;  %v224_v12 = vld [vmem:[%s417_s23 + $0x40] sm:$0xff]  ;;  %v225_v13 = vld [vmem:[%s417_s23 + $0x48] sm:$0xff] }
  0x14   : > { %249 = vst [vmem:[%s430_s29 + $0x19] sm:$0xff] %v217_v5  ;;  %250 = vst [vmem:[%s430_s29 + $0x21] sm:$0xff] %v218_v6  ;;  %v226_v14 = vld [vmem:[%s417_s23 + $0x50] sm:$0xff]  ;;  %v227_v15 = vld [vmem:[%s417_s23 + $0x58] sm:$0xff] }
  0x15   : > { %251 = vst [vmem:[%s430_s29 + $0x29] sm:$0xff] %v219_v7  ;;  %252 = vst [vmem:[%s430_s29 + $0x31] sm:$0xff] %v220_v8  ;;  %v228_v16 = vld [vmem:[%s417_s23 + $0x60] sm:$0xff]  ;;  %v229_v17 = vld [vmem:[%s417_s23 + $0x68] sm:$0xff] }
  0x16   : > { %253 = vst [vmem:[%s430_s29 + $0x39] sm:$0xff] %v221_v9  ;;  %210 = vst [vmem:[%s430_s29 + $0x51] sm:$0xff] %v206_v0  ;;  %v230_v18 = vld [vmem:[%s417_s23 + $0x70] sm:$0xff]  ;;  %v231_v19 = vld [vmem:[%s417_s23 + $0x78] sm:$0xf] }
  0x17   : > { %211 = vst [vmem:[%s430_s29 + $0x59] sm:$0xff] %v207_v2  ;;  %254 = vst [vmem:[%s430_s29 + $0x41] sm:$0xff] %v222_v10  ;;  %v200_v20 = vld [vmem:[%s409_s17 + $0x2] sm:$0x1]  ;;  %v233_v22 = vld [vmem:[%s417_s23 + $0x88] sm:$0xff] }
  0x18   : > { %255 = vst [vmem:[%s430_s29 + $0x49] sm:$0xf] %v223_v11  ;;  %203 = vst [vmem:[%s430_s29 + $0x50] sm:$0x1] %v199_v3  ;;  %v232_v21 = vld [vmem:[%s417_s23 + $0x80] sm:$0xff]  ;;  %v234_v23 = vld [vmem:[%s417_s23 + $0x90] sm:$0xff] }
  0x19   : > { %256 = vst [vmem:[%s430_s29 + $0x61] sm:$0xff] %v224_v12  ;;  %212 = vst [vmem:[%s430_s29 + $0xa1] sm:$0xff] %v206_v0  ;;  %v235_v24 = vld [vmem:[%s417_s23 + $0x98] sm:$0xff]  ;;  %v236_v25 = vld [vmem:[%s417_s23 + $0xa0] sm:$0xff] }
  0x1a   : > { %213 = vst [vmem:[%s430_s29 + $0xa9] sm:$0xff] %v207_v2  ;;  %257 = vst [vmem:[%s430_s29 + $0x69] sm:$0xff] %v225_v13  ;;  %v237_v26 = vld [vmem:[%s417_s23 + $0xa8] sm:$0xff]  ;;  %v238_v27 = vld [vmem:[%s417_s23 + $0xb0] sm:$0xff] }
  0x1b   : > { %258 = vst [vmem:[%s430_s29 + $0x71] sm:$0xff] %v226_v14  ;;  %259 = vst [vmem:[%s430_s29 + $0x79] sm:$0xff] %v227_v15  ;;  %v239_v28 = vld [vmem:[%s417_s23 + $0xb8] sm:$0xf]  ;;  %v201_v29 = vld [vmem:[%s409_s17 + $0x3] sm:$0x1] }
  0x1c   : > { %214 = vst [vmem:[%s430_s29 + $0xf1] sm:$0xff] %v206_v0  ;;  %215 = vst [vmem:[%s430_s29 + $0xf9] sm:$0xff] %v207_v2  ;;  %v240_v30 = vld [vmem:[%s417_s23 + $0xc0] sm:$0xff]  ;;  %v241_v31 = vld [vmem:[%s417_s23 + $0xc8] sm:$0xff] }
  0x1d   : > { %260 = vst [vmem:[%s430_s29 + $0x81] sm:$0xff] %v228_v16  ;;  %261 = vst [vmem:[%s430_s29 + $0x89] sm:$0xff] %v229_v17  ;;  %v242_v32 = vld [vmem:[%s417_s23 + $0xd0] sm:$0xff]  ;;  %v243_v33 = vld [vmem:[%s417_s23 + $0xd8] sm:$0xff] }
  0x1e   : > { %262 = vst [vmem:[%s430_s29 + $0x91] sm:$0xff] %v230_v18  ;;  %263 = vst [vmem:[%s430_s29 + $0x99] sm:$0xf] %v231_v19  ;;  %v244_v34 = vld [vmem:[%s417_s23 + $0xe0] sm:$0xff]  ;;  %v245_v35 = vld [vmem:[%s417_s23 + $0xe8] sm:$0xff] }
  0x1f   : > { %204 = vst [vmem:[%s430_s29 + $0xa0] sm:$0x1] %v200_v20  ;;  %264 = vst [vmem:[%s430_s29 + $0xb1] sm:$0xff] %v232_v21  ;;  %v246_v36 = vld [vmem:[%s417_s23 + $0xf0] sm:$0xff]  ;;  %v247_v37 = vld [vmem:[%s417_s23 + $0xf8] sm:$0xf] }
  0x20   : > { %265 = vst [vmem:[%s430_s29 + $0xb9] sm:$0xff] %v233_v22  ;;  %266 = vst [vmem:[%s430_s29 + $0xc1] sm:$0xff] %v234_v23 }
  0x21   : > { %267 = vst [vmem:[%s430_s29 + $0xc9] sm:$0xff] %v235_v24  ;;  %268 = vst [vmem:[%s430_s29 + $0xd1] sm:$0xff] %v236_v25 }
  0x22   : > { %269 = vst [vmem:[%s430_s29 + $0xd9] sm:$0xff] %v237_v26  ;;  %270 = vst [vmem:[%s430_s29 + $0xe1] sm:$0xff] %v238_v27 }
  0x23   : > { %271 = vst [vmem:[%s430_s29 + $0xe9] sm:$0xf] %v239_v28  ;;  %205 = vst [vmem:[%s430_s29 + $0xf0] sm:$0x1] %v201_v29 }
  0x24   : > { %272 = vst [vmem:[%s430_s29 + $0x101] sm:$0xff] %v240_v30  ;;  %273 = vst [vmem:[%s430_s29 + $0x109] sm:$0xff] %v241_v31 }
  0x25   : > { %274 = vst [vmem:[%s430_s29 + $0x111] sm:$0xff] %v242_v32  ;;  %275 = vst [vmem:[%s430_s29 + $0x119] sm:$0xff] %v243_v33 }
  0x26   : > { %276 = vst [vmem:[%s430_s29 + $0x121] sm:$0xff] %v244_v34  ;;  %277 = vst [vmem:[%s430_s29 + $0x129] sm:$0xff] %v245_v35 }
  0x27   : > { %278 = vst [vmem:[%s430_s29 + $0x131] sm:$0xff] %v246_v36  ;;  %279 = vst [vmem:[%s430_s29 + $0x139] sm:$0xf] %v247_v37 }
  0x28 PF: > { %s13_s12 = sadd.s32 1, %s376_s12  }
  0x29   : > { %p10_p4 = scmp.ge.s32.totalorder %s13_s12, 4  }
  0x2b   :  { %12 = sbr.rel (!%p10_p4) target bundleno = 1 (0x1), region = 65 }

</bundles_post_ra>
